<compile_context>
chip_gen: v5e
topology: v5e:2x2
jax: 0.10.0
libtpu: 0.0.40
codegen_flags: <defaults>
</compile_context>

<pallas_src>
import functools

import jax
import jax.numpy as jnp
from jax.experimental import pallas as pl
from jax.experimental.pallas import tpu as pltpu

LANES = 128
SMOOTH_NR = 1e-5
SMOOTH_DR = 1e-5
MAX_S_BLOCK = 4096                          # lane columns per grid step (static unroll <= 32)
_TILE_VMEM_BUDGET_BYTES = 12 * 1024 * 1024  # 2 inputs x 2 pipeline buffers, native dtype
_VMEM_LIMIT_BYTES = 24 * 1024 * 1024        # < v7x 32 MiB scoped default / 64 MiB physical


def _dice_block_kernel(pred_ref, targ_ref, inter_ref, denom_ref, *,
                       cols, s_block, needs_mask):
    """One grid step: fold a (rows, s_block) block into per-row partial sums."""
    i = pl.program_id(0)
    rows = pred_ref.shape[0]
    num_slices = s_block // LANES

    def accumulate(apply_mask):
        # Lane-width register partials; no VMEM accumulator read-modify-write.
        inter = jnp.zeros((rows, LANES), jnp.float32)
        denom = jnp.zeros((rows, LANES), jnp.float32)
        if apply_mask:
            # Hoisted iota (only the last, ragged step pays for masking at all).
            col0 = i * s_block + jax.lax.broadcasted_iota(jnp.int32, (rows, LANES), 1)
        for j in range(num_slices):                 # static, vreg-aligned slices
            lo, hi = j * LANES, (j + 1) * LANES
            x = pred_ref[:, lo:hi].astype(jnp.float32)
            t = targ_ref[:, lo:hi].astype(jnp.float32)
            # Single-EUP sigmoid: sigmoid(x) = 0.5 * tanh(x/2) + 0.5.
            p = 0.5 * jnp.tanh(0.5 * x) + 0.5
            if apply_mask:
                valid = (col0 + j * LANES) < cols
                # Select-based masking (NOT multiplicative) so OOB garbage / NaNs in the
                # padded tail cannot poison the sums.
                p = jnp.where(valid, p, 0.0)
                t = jnp.where(valid, t, 0.0)
            inter = inter + p * t                   # per-lane partial of sum(p * t)
            denom = denom + (p + t)                 # per-lane partial of sum(p) + sum(t)
        # One cross-lane reduce per block (XLU slot) and one tiny (rows, 1) store.
        inter_ref[0] = jnp.sum(inter, axis=1, keepdims=True)
        denom_ref[0] = jnp.sum(denom, axis=1, keepdims=True)

    if needs_mask:
        last = pl.num_programs(0) - 1

        @pl.when(i != last)
        def _():
            accumulate(False)

        @pl.when(i == last)
        def _():
            accumulate(True)
    else:
        accumulate(False)


def _round_up(x, m):
    return (x + m - 1) // m * m


def _choose_fold(bc, spatial):
    """Largest power-of-two F with spatial % F == 0, spatial // F >= 128 and
    bc * F <= 256: fills sublanes / deepens DMAs when B*C is small."""
    f = 1
    while (spatial % (2 * f) == 0
           and spatial // (2 * f) >= LANES
           and bc * (2 * f) <= 256):
        f *= 2
    return f


@jax.jit
def dice_loss(predicted, target):
    """Soft Dice loss of sigmoid(predicted) vs target. Returns an f32 scalar."""
    assert predicted.shape == target.shape
    b, c = predicted.shape[0], predicted.shape[1]
    bc = b * c
    spatial = 1
    for d in predicted.shape[2:]:
        spatial *= d

    fold = _choose_fold(bc, spatial)
    rows = bc * fold
    cols = spatial // fold

    # Pure reshapes (no pad, no dtype upcast): (B, C, *spatial) -> (bc*F, S/F).
    pred2d = predicted.reshape(rows, cols)
    targ2d = target.reshape(rows, cols)

    # Biggest lane-dense block that fits the tile budget: 2 inputs x 2 pipeline buffers
    # in native dtype (the accumulators are now only (rows, 128) register values).
    bytes_per_col = 2 * rows * (pred2d.dtype.itemsize + targ2d.dtype.itemsize)
    max_cols = max(LANES, (_TILE_VMEM_BUDGET_BYTES // bytes_per_col) // LANES * LANES)
    s_block = min(_round_up(cols, LANES), MAX_S_BLOCK, max_cols)

    nb = pl.cdiv(cols, s_block)
    needs_mask = (cols % s_block) != 0

    kernel = functools.partial(
        _dice_block_kernel,
        cols=cols,
        s_block=s_block,
        needs_mask=needs_mask,
    )

    inter_p, denom_p = pl.pallas_call(
        kernel,
        out_shape=(
            jax.ShapeDtypeStruct((nb, rows, 1), jnp.float32),
            jax.ShapeDtypeStruct((nb, rows, 1), jnp.float32),
        ),
        grid_spec=pltpu.PrefetchScalarGridSpec(
            num_scalar_prefetch=0,
            grid=(nb,),
            in_specs=[
                pl.BlockSpec((rows, s_block), lambda i: (0, i)),
                pl.BlockSpec((rows, s_block), lambda i: (0, i)),
            ],
            out_specs=(
                pl.BlockSpec((1, rows, 1), lambda i: (i, 0, 0)),
                pl.BlockSpec((1, rows, 1), lambda i: (i, 0, 0)),
            ),
        ),
        compiler_params=pltpu.CompilerParams(
            dimension_semantics=("parallel",),
            vmem_limit_bytes=_VMEM_LIMIT_BYTES,
        ),
    )(pred2d, targ2d)

    # Tiny finalize in XLA: combine per-block / per-fold partials, dice, mean over (b, c).
    inter = jnp.sum(inter_p.reshape(nb, bc, fold), axis=(0, 2))
    denom = jnp.sum(denom_p.reshape(nb, bc, fold), axis=(0, 2))
    dice = 1.0 - (2.0 * inter + SMOOTH_NR) / (denom + SMOOTH_DR)
    return jnp.mean(dice)


def dice_loss_ref(predicted, target):
    """Pure-JAX reference mirroring MONAI DiceLoss(sigmoid=True, to_onehot_y=False)."""
    p = jax.nn.sigmoid(predicted.astype(jnp.float32))
    t = target.astype(jnp.float32)
    axes = tuple(range(2, predicted.ndim))
    inter = jnp.sum(p * t, axis=axes)
    denom = jnp.sum(p, axis=axes) + jnp.sum(t, axis=axes)
    dice = 1.0 - (2.0 * inter + SMOOTH_NR) / (denom + SMOOTH_DR)
    return jnp.mean(dice)


if __name__ == "__main__":
    key = jax.random.PRNGKey(0)
    k1, k2 = jax.random.split(key)

    # Small shapes consistent with a multi-channel segmentation head: (B, C, H, W).
    # Narrow dtypes on purpose (perf review item): bf16 logits, uint8 binary mask.
    B, C, H, W = 2, 4, 16, 16
    predicted = jax.random.normal(k1, (B, C, H, W), dtype=jnp.bfloat16)        # logits
    target = (jax.random.uniform(k2, (B, C, H, W)) > 0.5).astype(jnp.uint8)    # binary mask

    out = dice_loss(predicted, target)
    jax.block_until_ready(out)

    ref = dice_loss_ref(predicted, target)
    assert jnp.allclose(out, ref, atol=5e-5, rtol=1e-4), (out, ref)

    print("KERNEL_OK")
</pallas_src>

<mosaic_0001>
module attributes {stable_mosaic.version = 11 : i64} {
  func.func @_dice_block_kernel(%arg0: i32, %arg1: memref<16x128xbf16, #tpu.memory_space<vmem>>, %arg2: memref<16x128xi8, #tpu.memory_space<vmem>>, %arg3: memref<1x16x1xf32, #tpu.memory_space<vmem>>, %arg4: memref<1x16x1xf32, #tpu.memory_space<vmem>>) attributes {dimension_semantics = [#tpu.dimension_semantics<parallel>], iteration_bounds = array<i64: 1>, scalar_prefetch = 0 : i64, scratch_operands = 0 : i64, tpu.core_type = #tpu.core_type<tc>, window_params = [{transform_indices = @transform_0, window_bounds = array<i64: 16, 128>}, {transform_indices = @transform_1, window_bounds = array<i64: 16, 128>}, {transform_indices = @transform_2, window_bounds = array<i64: 1, 16, 1>}, {transform_indices = @transform_3, window_bounds = array<i64: 1, 16, 1>}]} {
    %cst = arith.constant 0.000000e+00 : f32
    %0 = vector.broadcast %cst : f32 to vector<16x128xf32>
    %cst_0 = arith.constant 0.000000e+00 : f32
    %1 = vector.broadcast %cst_0 : f32 to vector<16x128xf32>
    %c0 = arith.constant 0 : index
    %c0_1 = arith.constant 0 : index
    %2 = vector.load %arg1[%c0, %c0_1] : memref<16x128xbf16, #tpu.memory_space<vmem>>, vector<16x128xbf16>
    %3 = arith.extf %2 : vector<16x128xbf16> to vector<16x128xf32>
    %c0_2 = arith.constant 0 : index
    %c0_3 = arith.constant 0 : index
    %4 = vector.load %arg2[%c0_2, %c0_3] : memref<16x128xi8, #tpu.memory_space<vmem>>, vector<16x128xi8>
    %5 = arith.uitofp %4 : vector<16x128xi8> to vector<16x128xf32>
    %cst_4 = arith.constant 5.000000e-01 : f32
    %6 = vector.broadcast %cst_4 : f32 to vector<16x128xf32>
    %7 = arith.mulf %6, %3 : vector<16x128xf32>
    %8 = math.tanh %7 : vector<16x128xf32>
    %cst_5 = arith.constant 5.000000e-01 : f32
    %9 = vector.broadcast %cst_5 : f32 to vector<16x128xf32>
    %10 = arith.mulf %9, %8 : vector<16x128xf32>
    %cst_6 = arith.constant 5.000000e-01 : f32
    %11 = vector.broadcast %cst_6 : f32 to vector<16x128xf32>
    %12 = arith.addf %10, %11 : vector<16x128xf32>
    %13 = arith.mulf %12, %5 : vector<16x128xf32>
    %14 = arith.addf %0, %13 : vector<16x128xf32>
    %15 = arith.addf %12, %5 : vector<16x128xf32>
    %16 = arith.addf %1, %15 : vector<16x128xf32>
    %cst_7 = arith.constant dense<0.000000e+00> : vector<16xf32>
    %17 = vector.multi_reduction <add>, %14, %cst_7 [1] : vector<16x128xf32> to vector<16xf32>
    %18 = vector.shape_cast %17 : vector<16xf32> to vector<16x1xf32>
    %c0_8 = arith.constant 0 : index
    %c0_9 = arith.constant 0 : index
    %c0_10 = arith.constant 0 : index
    %19 = vector.load %arg3[%c0_8, %c0_9, %c0_10] : memref<1x16x1xf32, #tpu.memory_space<vmem>>, vector<1x16x1xf32>
    %20 = vector.shape_cast %19 : vector<1x16x1xf32> to vector<16x1xf32>
    %21 = vector.shape_cast %18 : vector<16x1xf32> to vector<1x16x1xf32>
    tpu.vector_store %arg3[%c0_8, %c0_9, %c0_10], %21 {strides = array<i32>} : memref<1x16x1xf32, #tpu.memory_space<vmem>>, vector<1x16x1xf32>,
    %cst_11 = arith.constant dense<0.000000e+00> : vector<16xf32>
    %22 = vector.multi_reduction <add>, %16, %cst_11 [1] : vector<16x128xf32> to vector<16xf32>
    %23 = vector.shape_cast %22 : vector<16xf32> to vector<16x1xf32>
    %c0_12 = arith.constant 0 : index
    %c0_13 = arith.constant 0 : index
    %c0_14 = arith.constant 0 : index
    %24 = vector.load %arg4[%c0_12, %c0_13, %c0_14] : memref<1x16x1xf32, #tpu.memory_space<vmem>>, vector<1x16x1xf32>
    %25 = vector.shape_cast %24 : vector<1x16x1xf32> to vector<16x1xf32>
    %26 = vector.shape_cast %23 : vector<16x1xf32> to vector<1x16x1xf32>
    tpu.vector_store %arg4[%c0_12, %c0_13, %c0_14], %26 {strides = array<i32>} : memref<1x16x1xf32, #tpu.memory_space<vmem>>, vector<1x16x1xf32>,
    return
  }
  func.func @transform_0(%arg0: i32) -> (i32, i32) {
    %c0_i32 = arith.constant 0 : i32
    %c0_i32_0 = arith.constant 0 : i32
    return %c0_i32, %arg0 : i32, i32
  }
  func.func @transform_1(%arg0: i32) -> (i32, i32) {
    %c0_i32 = arith.constant 0 : i32
    %c0_i32_0 = arith.constant 0 : i32
    return %c0_i32, %arg0 : i32, i32
  }
  func.func @transform_2(%arg0: i32) -> (i32, i32, i32) {
    %c0_i32 = arith.constant 0 : i32
    %c0_i32_0 = arith.constant 0 : i32
    %c0_i32_1 = arith.constant 0 : i32
    return %arg0, %c0_i32, %c0_i32_0 : i32, i32, i32
  }
  func.func @transform_3(%arg0: i32) -> (i32, i32, i32) {
    %c0_i32 = arith.constant 0 : i32
    %c0_i32_0 = arith.constant 0 : i32
    %c0_i32_1 = arith.constant 0 : i32
    return %arg0, %c0_i32, %c0_i32_0 : i32, i32, i32
  }
}

</mosaic_0001>

<bundles_post_ra>
// kernel: dice_loss.1
= control target key start
LH: loop header
LB: loop body
LE: loop exit
PB: predicated region body
PF: predicated region fallthrough
CT: control target
= control target key end

     0   :  { %vm45_vm0 = vcmask 7168   ;;  %s112_s0 = inlined_call_operand.vmem [shape: bf16[16,128], index: 0, kind: input, shape index: {}]   ;;  %s113_s1 = inlined_call_operand.vmem [shape: u8[16,128], index: 1, kind: input, shape index: {}]   ;;  %s114_s3 = inlined_call_operand.vmem [shape: f32[1,16,1], index: 3, kind: output, shape index: {1}]   ;;  %s115_s2 = inlined_call_operand.vmem [shape: f32[1,16,1], index: 2, kind: output, shape index: {0}]  }
   0x1   :  { %v63_v0 = vld [vmem:[%s112_s0] sm:$0xff]  }
   0x2   :  { %v64_v1 = vunpack.c.l.bf16 %v63_v0  ;;  %v67_v2 = vld [vmem:[%s113_s1] sm:$0xf]   ;;  %v65_v3 = vunpack.c.h.bf16 %v63_v0 }
   0x3   :  { %v68_v6 = vunpack.c.0.s8 %v67_v2  ;;  %v69_v8 = vunpack.c.1.s8 %v67_v2 }
   0x4   :  { %v25_v4 = vmul.f32 0.5, %v64_v1  ;;  %v26_v5 = vmul.f32 0.5, %v65_v3 }
   0x5   :  { %v21_v7 = vand.u32 255, %v68_v6  ;;  %v22_v14 = vand.u32 255, %v69_v8 }
   0x6   :  { %70 = vtanh.f32 %v25_v4 }
   0x7   :  { %72 = vtanh.f32 %v26_v5  ;;  %v23_v11 = vcvt.s32.f32 %v21_v7  ;;  %v24_v18 = vcvt.s32.f32 %v22_v14 }
   0xc   :  { %v71_v9 = vpop.eup %70 }
   0xd   :  { %v73_v10 = vpop.eup %72  ;;  %v29_v12 = vmul.f32 0.5, %v71_v9 }
   0xe   :  { %v30_v15 = vmul.f32 0.5, %v73_v10 }
   0xf   :  { %v31_v13 = vadd.f32 0.5, %v29_v12 }
  0x10   :  { %v32_v19 = vadd.f32 0.5, %v30_v15 }
  0x11   :  { %v37_v16 = vadd.f32 %v31_v13, %v23_v11  ;;  %v33_v17 = vmul.f32 %v31_v13, %v23_v11 }
  0x12   :  { %v38_v20 = vadd.f32 %v32_v19, %v24_v18  ;;  %v34_v21 = vmul.f32 %v32_v19, %v24_v18 }
  0x13   :  { %48 = vadd.xlane.f32.xlu1 %v37_v16  ;;  %41 = vadd.xlane.f32.xlu0 %v33_v17 }
  0x1b   :  { %50 = vadd.xlane.f32.xlu1 %v38_v20  ;;  %43 = vadd.xlane.f32.xlu0 %v34_v21 }
  0x86   :  { %v49_v22 = vpop.xlane.xlu1 %48  ;;  %v42_v23 = vpop.xlane.xlu0 %41 }
  0x87   :  { %52 = vst.msk [vmem:[%s114_s3] sm:$0xff] %vm45_vm0, %v49_v22 }
  0x88   :  { %46 = vst.msk [vmem:[%s115_s2] sm:$0xff] %vm45_vm0, %v42_v23 }
  0x8e   :  { %v51_v24 = vpop.xlane.xlu1 %50  ;;  %v44_v25 = vpop.xlane.xlu0 %43 }
  0x8f   :  { %53 = vst.msk [vmem:[%s114_s3 + $0x8] sm:$0xff] %vm45_vm0, %v51_v24 }
  0x90   :  { %47 = vst.msk [vmem:[%s115_s2 + $0x8] sm:$0xff] %vm45_vm0, %v44_v25 }

</bundles_post_ra>
